<compile_context>
chip_gen: v5e
topology: v5e:2x2
jax: 0.10.0
libtpu: 0.0.40
codegen_flags: <defaults>
</compile_context>

<pallas_src>
import functools

import jax
import jax.numpy as jnp
from jax.experimental import pallas as pl
from jax.experimental.pallas import tpu as pltpu


def _query_mask_kernel(query_text_ref, mask_ref, *, num_word):
    # query_mask = (query_text != num_word).float()
    mask_ref[...] = (query_text_ref[...] != num_word).astype(jnp.float32)


def query_mask_pallas(query_text, num_word):
    """(query_text != num_word).astype(float32) with a lane-dense Pallas kernel."""
    B, L = query_text.shape
    query_text = query_text.astype(jnp.int32)

    # Sublane block of 8, lane block of up to 512 (multiple of 128).
    block_b = 8
    lane_block = min(512, pl.cdiv(max(L, 1), 128) * 128)
    B_pad = pl.cdiv(B, block_b) * block_b
    L_pad = pl.cdiv(max(L, 1), lane_block) * lane_block

    # Pad with the padding-token id (num_word); the padded region is sliced off
    # afterwards, so its value is irrelevant for correctness.
    if (B_pad, L_pad) != (B, L):
        qt = jnp.pad(query_text, ((0, B_pad - B), (0, L_pad - L)),
                     constant_values=int(num_word))
    else:
        qt = query_text

    grid = (B_pad // block_b, L_pad // lane_block)

    mask_padded = pl.pallas_call(
        functools.partial(_query_mask_kernel, num_word=int(num_word)),
        out_shape=jax.ShapeDtypeStruct((B_pad, L_pad), jnp.float32),
        grid=grid,
        in_specs=[pl.BlockSpec((block_b, lane_block), lambda i, j: (i, j))],
        out_specs=pl.BlockSpec((block_b, lane_block), lambda i, j: (i, j)),
        compiler_params=pltpu.CompilerParams(
            dimension_semantics=("parallel", "parallel")),
    )(qt)

    return mask_padded[:B, :L]


def nsm_agent_deal_input(local_entity, query_entities, query_text,
                         seed_dist, answer_dist, num_word):
    """JAX/Pallas implementation of NsmAgent.deal_input_seq.

    Mirrors the PyTorch tensor returns:
      (current_dist, query_text, query_mask, answer_dist, local_entity, query_entities)
    (kb_adj_mat / true_batch_id / query_string_list are untouched pass-throughs
    in the original and are omitted here.)
    """
    query_text_i = query_text.astype(jnp.int32)          # LongTensor cast
    query_mask = query_mask_pallas(query_text_i, num_word)

    # Pure dtype plumbing, no compute: keep in plain JAX (no-op for f32 inputs).
    current_dist = seed_dist.astype(jnp.float32)          # Variable(seed_dist)
    answer_f = answer_dist.astype(jnp.float32)
    query_ent_f = query_entities.astype(jnp.float32)
    local_entity_i = local_entity.astype(jnp.int32)       # LongTensor cast

    return (current_dist, query_text_i, query_mask,
            answer_f, local_entity_i, query_ent_f)


if __name__ == "__main__":
    key = jax.random.PRNGKey(0)
    k1, k2, k3, k4, k5 = jax.random.split(key, 5)

    batch = 2
    max_query_len = 8
    max_local_entity = 16
    num_word = 30          # padding token id == vocab size, as in the module

    # query_text contains ids in [0, num_word]; entries equal to num_word are padding
    query_text = jax.random.randint(k1, (batch, max_query_len), 0, num_word + 1,
                                    dtype=jnp.int32)
    local_entity = jax.random.randint(k2, (batch, max_local_entity), 0, 100,
                                      dtype=jnp.int32)
    seed_dist = jax.random.uniform(k3, (batch, max_local_entity), dtype=jnp.float32)
    answer_dist = jax.random.uniform(k4, (batch, max_local_entity), dtype=jnp.float32)
    query_entities = (jax.random.uniform(k5, (batch, max_local_entity)) > 0.8
                      ).astype(jnp.float32)

    outs = nsm_agent_deal_input(local_entity, query_entities, query_text,
                                seed_dist, answer_dist, num_word)
    outs = jax.block_until_ready(outs)
    current_dist, q_text, query_mask, answer_f, local_entity_i, query_ent_f = outs

    # reference check (plain jnp)
    ref_mask = (query_text != num_word).astype(jnp.float32)
    assert query_mask.shape == (batch, max_query_len)
    assert jnp.allclose(query_mask, ref_mask)
    assert jnp.allclose(current_dist, seed_dist)
    assert jnp.allclose(answer_f, answer_dist)
    assert jnp.allclose(query_ent_f, query_entities)
    assert q_text.dtype == jnp.int32 and local_entity_i.dtype == jnp.int32

    print("KERNEL_OK")
</pallas_src>

<mosaic_0001>
module attributes {stable_mosaic.version = 11 : i64} {
  func.func @_query_mask_kernel(%arg0: i32, %arg1: i32, %arg2: memref<8x128xi32, #tpu.memory_space<vmem>>, %arg3: memref<8x128xf32, #tpu.memory_space<vmem>>) attributes {dimension_semantics = [#tpu.dimension_semantics<parallel>, #tpu.dimension_semantics<parallel>], iteration_bounds = array<i64: 1, 1>, scalar_prefetch = 0 : i64, scratch_operands = 0 : i64, tpu.core_type = #tpu.core_type<tc>, window_params = [{transform_indices = @transform_0, window_bounds = array<i64: 8, 128>}, {transform_indices = @transform_1, window_bounds = array<i64: 8, 128>}]} {
    %c0 = arith.constant 0 : index
    %c0_0 = arith.constant 0 : index
    %0 = vector.load %arg2[%c0, %c0_0] : memref<8x128xi32, #tpu.memory_space<vmem>>, vector<8x128xi32>
    %c30_i32 = arith.constant 30 : i32
    %1 = vector.broadcast %c30_i32 : i32 to vector<8x128xi32>
    %2 = arith.cmpi ne, %0, %1 : vector<8x128xi32>
    %3 = arith.extui %2 : vector<8x128xi1> to vector<8x128xi32>
    %4 = arith.sitofp %3 : vector<8x128xi32> to vector<8x128xf32>
    %c0_1 = arith.constant 0 : index
    %c0_2 = arith.constant 0 : index
    %5 = vector.load %arg3[%c0_1, %c0_2] : memref<8x128xf32, #tpu.memory_space<vmem>>, vector<8x128xf32>
    tpu.vector_store %arg3[%c0_1, %c0_2], %4 {strides = array<i32>} : memref<8x128xf32, #tpu.memory_space<vmem>>, vector<8x128xf32>,
    return
  }
  func.func @transform_0(%arg0: i32, %arg1: i32) -> (i32, i32) {
    %c0_i32 = arith.constant 0 : i32
    return %arg0, %arg1 : i32, i32
  }
  func.func @transform_1(%arg0: i32, %arg1: i32) -> (i32, i32) {
    %c0_i32 = arith.constant 0 : i32
    return %arg0, %arg1 : i32, i32
  }
}

</mosaic_0001>

<bundles_post_ra>
// kernel: tpu_custom_call.1
= control target key start
LH: loop header
LB: loop body
LE: loop exit
PB: predicated region body
PF: predicated region fallthrough
CT: control target
= control target key end

     0   :  { %6 = vsyncpa [#allocation3], 0  ;;  %s120_s0 = inlined_call_operand.hbm [shape: s32[8,128], index: 0, kind: input, shape index: {}]   ;;  %s121_s1 = inlined_call_operand.hbm [shape: f32[8,128], index: 1, kind: output, shape index: {}]  }
   0x1   :  { %7 = vsyncpa [#allocation4], 0  ;;  %s13_s8 = sshll.u32 %s120_s0, 4  ;;  %s101_s9 = smov [#allocation2]   ;;  %s14_s8 = int_to_ptr.hbm [resolvable:$true] %s13_s8 }
   0x2   :  { %s15_s10 = sshll.u32 %s101_s9, 4  ;;  %s16_s10 = int_to_ptr.vmem [resolvable:$true] %s15_s10 }
   0x3   :  { %18 = dma.hbm_to_vmem [thread:$0]  %s14_s8, 128, %s16_s10, [#allocation3]  }
   0x4   :  { %97 = dma.done.wait [#allocation3], 128  }
   0x5   :  { %98 = vsyncadd [#allocation3], 4294967168  ;;  %s102_s11 = smov [#allocation5]   ;;  %s35_s15 = sshll.u32 %s121_s1, 4  ;;  %v23_v0 = vld [vmem:[#allocation2] sm:$0xff]  ;;  %v103_v1 = vmov 0.0   ;;  %s36_s15 = int_to_ptr.hbm [resolvable:$true] %s35_s15 }
   0x6   :  { %s33_s12 = sshll.u32 %s102_s11, 4  ;;  %vm24_vm0 = vcmp.ne.s32.totalorder %v23_v0, 30  ;;  %s34_s12 = int_to_ptr.vmem [resolvable:$true] %s33_s12 }
   0x7   :  { %v45_v2 = vsel %vm24_vm0, 1.0, %v103_v1 }
   0x8   :  { %27 = vst [vmem:[#allocation5] sm:$0xff] %v45_v2 }
   0x9   :  { %38 = dma.vmem_to_hbm [thread:$0]  %s34_s12, 128, %s36_s15, [#allocation4]  }
   0xa   :  { %99 = dma.done.wait [#allocation4], 128  }
   0xb   :  { %100 = vsyncadd [#allocation4], 4294967168 }
   0xc   :  { %43 = vsyncpa [#allocation3], 1 }
   0xd   :  { %44 = vsyncpa [#allocation4], 1 }

</bundles_post_ra>
